<compile_context>
chip_gen: v6e
topology: v6e:2x2x1
jax: 0.10.0
libtpu: 0.0.40
codegen_flags: <defaults>
</compile_context>

<pallas_src>
import functools

import jax
import jax.numpy as jnp
from jax.experimental import pallas as pl
from jax.experimental.pallas import tpu as pltpu

CLASS_NUM = 6
SMOOTH = 0.0          # forward() overwrites self.smooth with 0.0
_LANES = 128


def _native_sublanes(dtype):
    # Rows of one native (sublane, 128-lane) tile: 8 for 4-byte, 16 for 2-byte.
    return max(8, 32 // jnp.dtype(dtype).itemsize)


def _vmem_capacity_bytes():
    try:
        return int(pltpu.get_tpu_info().vmem_capacity_bytes)
    except Exception:
        return 64 * 1024 * 1024     # conservative: v7x per-TensorCore VMEM


def _pick_fold(hw, dtypes):
    """Spatial fold factor that fills the native sublane tile of every stream."""
    need = max(_native_sublanes(d) for d in dtypes)
    fold = need
    while fold > 1 and hw % fold:
        fold //= 2
    return fold


def _pick_tile(hwf, fold, dtypes, budget_bytes):
    """Widest 128-aligned lane tile whose double-buffered input blocks fit."""
    per_lane = 0
    for d in dtypes:
        nat = _native_sublanes(d)
        padded_rows = -(-fold // nat) * nat            # ceil to native sublanes
        per_lane += 2 * padded_rows * jnp.dtype(d).itemsize   # 2 pipeline buffers
    tile = max((budget_bytes // per_lane) // _LANES * _LANES, _LANES)
    if hwf <= tile:
        return hwf                                     # single full-width block
    return tile


def _soft_dice_partial_kernel(x_ref, t_ref, inter_ref, union_ref, *,
                              hwf, tile, ragged):
    """Accumulate per-(batch, class) partial sums for one spatial tile.

    x_ref, t_ref : (FOLD, TILE) blocks of logits / targets for class cc+1.
    inter_ref, union_ref : (FOLD, 1) accumulators, VMEM-resident across j.
    """
    j = pl.program_id(2)

    @pl.when(j == 0)
    def _init():
        inter_ref[...] = jnp.zeros_like(inter_ref)
        union_ref[...] = jnp.zeros_like(union_ref)

    x = x_ref[...].astype(jnp.float32)     # in-kernel cast: free on the VPU
    t = t_ref[...].astype(jnp.float32)
    p = jnp.exp(x)                          # EUP

    if ragged:                              # static: only emitted when needed
        lane = jax.lax.broadcasted_iota(jnp.int32, x.shape, 1)
        valid = hwf - j * tile              # >= tile for all but the last tile
        mask = lane < valid
        p = jnp.where(mask, p, 0.0)
        t = jnp.where(mask, t, 0.0)

    inter_ref[...] += jnp.sum(p * t, axis=1, keepdims=True)
    union_ref[...] += jnp.sum(p + t, axis=1, keepdims=True)


def soft_dice_loss(inp, target, class_num=CLASS_NUM, *, max_tile=None):
    """inp, target: (N, C, H, W) -> loss of shape (1,) float32.

    `max_tile` (multiple of 128) is a test-only knob to force small tiles.
    """
    n, c, h, w = inp.shape
    assert c == class_num and class_num >= 2
    hw = h * w

    def prep(a):
        # f32 / bf16 / f16 are streamed as-is (cast to f32 inside the kernel);
        # anything else takes the rare wrapper-cast path.
        if a.dtype not in (jnp.float32, jnp.bfloat16, jnp.float16):
            a = a.astype(jnp.float32)
        return a

    x, t = prep(inp), prep(target)
    dtypes = (x.dtype, t.dtype)

    fold = _pick_fold(hw, dtypes)
    hwf = hw // fold
    # Free, contiguous reshape: fold spatial into the sublane axis.
    x4 = x.reshape(n, c, fold, hwf)
    t4 = t.reshape(n, c, fold, hwf)

    cap = _vmem_capacity_bytes()
    budget = (cap * 2) // 5                # ~40% of VMEM for double-buffered inputs
    tile = _pick_tile(hwf, fold, dtypes, budget)
    if max_tile is not None:
        tile = min(tile, max_tile)
    num_tiles = pl.cdiv(hwf, tile)
    ragged = (hwf % tile) != 0
    vmem_limit = min(cap, budget + (8 << 20))

    total = n * (c - 1) * hw               # class 0 is never streamed
    cost = pl.CostEstimate(
        flops=5 * total,
        transcendentals=total,
        bytes_accessed=total * sum(jnp.dtype(d).itemsize for d in dtypes)
        + 2 * n * (c - 1) * fold * 4,
    )

    part_shape = jax.ShapeDtypeStruct((n, c - 1, fold, 1), jnp.float32)
    acc_spec = pl.BlockSpec((None, None, fold, 1), lambda i, cc, j: (i, cc, 0, 0))
    in_spec = pl.BlockSpec((None, None, fold, tile),
                           lambda i, cc, j: (i, cc + 1, 0, j))   # skip class 0

    inter_p, union_p = pl.pallas_call(
        functools.partial(_soft_dice_partial_kernel,
                          hwf=hwf, tile=tile, ragged=ragged),
        grid=(n, c - 1, num_tiles),
        in_specs=[in_spec, in_spec],
        out_specs=[acc_spec, acc_spec],
        out_shape=(part_shape, part_shape),
        compiler_params=pltpu.CompilerParams(
            dimension_semantics=("parallel", "parallel", "arbitrary"),
            vmem_limit_bytes=vmem_limit,
        ),
        cost_estimate=cost,
    )(x4, t4)

    # Tiny O(N*C*FOLD) epilogue in JAX (cross-core combine + dice ratio).
    inter = jnp.sum(inter_p, axis=(0, 2, 3))      # (C-1,)
    union = jnp.sum(union_p, axis=(0, 2, 3))      # (C-1,)
    dice = (2.0 * inter + SMOOTH) / (union + SMOOTH)
    loss = 1.0 - jnp.sum(dice) / jnp.float32(class_num - 1)
    return jnp.reshape(loss, (1,)).astype(jnp.float32)


def _reference(inp, target, class_num=CLASS_NUM):
    p = jnp.exp(inp.astype(jnp.float32))
    t = target.astype(jnp.float32)
    dice = jnp.float32(0.0)
    for i in range(1, class_num):
        pred = p[:, i]
        gt = t[:, i]
        inter = jnp.sum(pred * gt)
        union = jnp.sum(pred) + jnp.sum(gt)
        dice = dice + (2.0 * inter + SMOOTH) / (union + SMOOTH)
    return jnp.reshape(1.0 - dice / (class_num - 1), (1,))


if __name__ == "__main__":
    key = jax.random.PRNGKey(0)
    k1, k2, k3, k4 = jax.random.split(key, 4)

    # Case 1: basic NCHW float32, single full-width tile.
    N, C, H, W = 2, CLASS_NUM, 16, 16
    x = jax.random.normal(k1, (N, C, H, W), dtype=jnp.float32)
    tgt = jax.nn.softmax(jax.random.normal(k2, (N, C, H, W), dtype=jnp.float32), axis=1)
    out = jax.block_until_ready(soft_dice_loss(x, tgt))
    ref = jax.block_until_ready(_reference(x, tgt))
    assert out.shape == (1,)
    assert jnp.allclose(out, ref, rtol=1e-5, atol=1e-5), (out, ref)

    # Case 2: ragged lane tile (exercises the in-kernel masking path).
    H2, W2 = 24, 50            # hw=1200, fold=8 -> hwf=150 -> 128-wide tile + ragged 22
    x2 = jax.random.normal(k3, (N, C, H2, W2), dtype=jnp.float32)
    tgt2 = jax.nn.softmax(jax.random.normal(k4, (N, C, H2, W2), dtype=jnp.float32), axis=1)
    out2 = jax.block_until_ready(soft_dice_loss(x2, tgt2, max_tile=128))
    ref2 = jax.block_until_ready(_reference(x2, tgt2))
    assert jnp.allclose(out2, ref2, rtol=1e-4, atol=1e-4), (out2, ref2)

    # Case 3: bf16 targets stream at half the bytes (fold becomes 16), f32 logits.
    tgt2_bf16 = tgt2.astype(jnp.bfloat16)
    out3 = jax.block_until_ready(soft_dice_loss(x2, tgt2_bf16))
    ref3 = jax.block_until_ready(_reference(x2, tgt2_bf16))
    assert jnp.allclose(out3, ref3, rtol=1e-4, atol=1e-4), (out3, ref3)

    print("KERNEL_OK")
</pallas_src>

<mosaic_0001>
module attributes {stable_mosaic.version = 11 : i64} {
  func.func @_soft_dice_partial_kernel(%arg0: i32, %arg1: i32, %arg2: i32, %arg3: memref<1x1x8x32xf32, #tpu.memory_space<vmem>>, %arg4: memref<1x1x8x32xf32, #tpu.memory_space<vmem>>, %arg5: memref<1x1x8x1xf32, #tpu.memory_space<vmem>>, %arg6: memref<1x1x8x1xf32, #tpu.memory_space<vmem>>) attributes {dimension_semantics = [#tpu.dimension_semantics<parallel>, #tpu.dimension_semantics<parallel>, #tpu.dimension_semantics<arbitrary>], iteration_bounds = array<i64: 2, 5, 1>, scalar_prefetch = 0 : i64, scratch_operands = 0 : i64, tpu.core_type = #tpu.core_type<tc>, window_params = [{transform_indices = @transform_0, window_bounds = array<i64: 1, 1, 8, 32>}, {transform_indices = @transform_1, window_bounds = array<i64: 1, 1, 8, 32>}, {transform_indices = @transform_2, window_bounds = array<i64: 1, 1, 8, 1>}, {transform_indices = @transform_3, window_bounds = array<i64: 1, 1, 8, 1>}]} {
    %c0_i32 = arith.constant 0 : i32
    %0 = arith.cmpi eq, %arg2, %c0_i32 : i32
    %1 = arith.extui %0 : i1 to i32
    %c0_i32_0 = arith.constant 0 : i32
    %2 = arith.cmpi ne, %1, %c0_i32_0 : i32
    scf.if %2 {
      %cst_25 = arith.constant 0.000000e+00 : f32
      %26 = vector.broadcast %cst_25 : f32 to vector<8x1xf32>
      %c0_26 = arith.constant 0 : index
      %c0_27 = arith.constant 0 : index
      %c0_28 = arith.constant 0 : index
      %c0_29 = arith.constant 0 : index
      %27 = vector.load %arg5[%c0_26, %c0_27, %c0_28, %c0_29] : memref<1x1x8x1xf32, #tpu.memory_space<vmem>>, vector<1x1x8x1xf32>
      %28 = vector.shape_cast %27 : vector<1x1x8x1xf32> to vector<8x1xf32>
      %29 = vector.shape_cast %26 : vector<8x1xf32> to vector<1x1x8x1xf32>
      tpu.vector_store %arg5[%c0_26, %c0_27, %c0_28, %c0_29], %29 {strides = array<i32>} : memref<1x1x8x1xf32, #tpu.memory_space<vmem>>, vector<1x1x8x1xf32>,
      %cst_30 = arith.constant 0.000000e+00 : f32
      %30 = vector.broadcast %cst_30 : f32 to vector<8x1xf32>
      %c0_31 = arith.constant 0 : index
      %c0_32 = arith.constant 0 : index
      %c0_33 = arith.constant 0 : index
      %c0_34 = arith.constant 0 : index
      %31 = vector.load %arg6[%c0_31, %c0_32, %c0_33, %c0_34] : memref<1x1x8x1xf32, #tpu.memory_space<vmem>>, vector<1x1x8x1xf32>
      %32 = vector.shape_cast %31 : vector<1x1x8x1xf32> to vector<8x1xf32>
      %33 = vector.shape_cast %30 : vector<8x1xf32> to vector<1x1x8x1xf32>
      tpu.vector_store %arg6[%c0_31, %c0_32, %c0_33, %c0_34], %33 {strides = array<i32>} : memref<1x1x8x1xf32, #tpu.memory_space<vmem>>, vector<1x1x8x1xf32>,
    } else {
    }
    %c0 = arith.constant 0 : index
    %c0_1 = arith.constant 0 : index
    %c0_2 = arith.constant 0 : index
    %c0_3 = arith.constant 0 : index
    %3 = vector.load %arg3[%c0, %c0_1, %c0_2, %c0_3] : memref<1x1x8x32xf32, #tpu.memory_space<vmem>>, vector<1x1x8x32xf32>
    %4 = vector.shape_cast %3 : vector<1x1x8x32xf32> to vector<8x32xf32>
    %c0_4 = arith.constant 0 : index
    %c0_5 = arith.constant 0 : index
    %c0_6 = arith.constant 0 : index
    %c0_7 = arith.constant 0 : index
    %5 = vector.load %arg4[%c0_4, %c0_5, %c0_6, %c0_7] : memref<1x1x8x32xf32, #tpu.memory_space<vmem>>, vector<1x1x8x32xf32>
    %6 = vector.shape_cast %5 : vector<1x1x8x32xf32> to vector<8x32xf32>
    %7 = math.exp %4 : vector<8x32xf32>
    %c0_8 = arith.constant 0 : index
    %c0_9 = arith.constant 0 : index
    %c0_10 = arith.constant 0 : index
    %c0_11 = arith.constant 0 : index
    %8 = vector.load %arg5[%c0_8, %c0_9, %c0_10, %c0_11] : memref<1x1x8x1xf32, #tpu.memory_space<vmem>>, vector<1x1x8x1xf32>
    %9 = vector.shape_cast %8 : vector<1x1x8x1xf32> to vector<8x1xf32>
    %10 = arith.mulf %7, %6 : vector<8x32xf32>
    %cst = arith.constant dense<0.000000e+00> : vector<8xf32>
    %11 = vector.multi_reduction <add>, %10, %cst [1] : vector<8x32xf32> to vector<8xf32>
    %12 = vector.shape_cast %11 : vector<8xf32> to vector<8x1xf32>
    %13 = arith.addf %9, %12 : vector<8x1xf32>
    %c0_12 = arith.constant 0 : index
    %c0_13 = arith.constant 0 : index
    %c0_14 = arith.constant 0 : index
    %c0_15 = arith.constant 0 : index
    %14 = vector.load %arg5[%c0_12, %c0_13, %c0_14, %c0_15] : memref<1x1x8x1xf32, #tpu.memory_space<vmem>>, vector<1x1x8x1xf32>
    %15 = vector.shape_cast %14 : vector<1x1x8x1xf32> to vector<8x1xf32>
    %16 = vector.shape_cast %13 : vector<8x1xf32> to vector<1x1x8x1xf32>
    tpu.vector_store %arg5[%c0_12, %c0_13, %c0_14, %c0_15], %16 {strides = array<i32>} : memref<1x1x8x1xf32, #tpu.memory_space<vmem>>, vector<1x1x8x1xf32>,
    %c0_16 = arith.constant 0 : index
    %c0_17 = arith.constant 0 : index
    %c0_18 = arith.constant 0 : index
    %c0_19 = arith.constant 0 : index
    %17 = vector.load %arg6[%c0_16, %c0_17, %c0_18, %c0_19] : memref<1x1x8x1xf32, #tpu.memory_space<vmem>>, vector<1x1x8x1xf32>
    %18 = vector.shape_cast %17 : vector<1x1x8x1xf32> to vector<8x1xf32>
    %19 = arith.addf %7, %6 : vector<8x32xf32>
    %cst_20 = arith.constant dense<0.000000e+00> : vector<8xf32>
    %20 = vector.multi_reduction <add>, %19, %cst_20 [1] : vector<8x32xf32> to vector<8xf32>
    %21 = vector.shape_cast %20 : vector<8xf32> to vector<8x1xf32>
    %22 = arith.addf %18, %21 : vector<8x1xf32>
    %c0_21 = arith.constant 0 : index
    %c0_22 = arith.constant 0 : index
    %c0_23 = arith.constant 0 : index
    %c0_24 = arith.constant 0 : index
    %23 = vector.load %arg6[%c0_21, %c0_22, %c0_23, %c0_24] : memref<1x1x8x1xf32, #tpu.memory_space<vmem>>, vector<1x1x8x1xf32>
    %24 = vector.shape_cast %23 : vector<1x1x8x1xf32> to vector<8x1xf32>
    %25 = vector.shape_cast %22 : vector<8x1xf32> to vector<1x1x8x1xf32>
    tpu.vector_store %arg6[%c0_21, %c0_22, %c0_23, %c0_24], %25 {strides = array<i32>} : memref<1x1x8x1xf32, #tpu.memory_space<vmem>>, vector<1x1x8x1xf32>,
    return
  }
  func.func @transform_0(%arg0: i32, %arg1: i32, %arg2: i32) -> (i32, i32, i32, i32) {
    %c1_i32 = arith.constant 1 : i32
    %0 = arith.addi %arg1, %c1_i32 : i32
    %c0_i32 = arith.constant 0 : i32
    %c0_i32_0 = arith.constant 0 : i32
    return %arg0, %0, %c0_i32, %arg2 : i32, i32, i32, i32
  }
  func.func @transform_1(%arg0: i32, %arg1: i32, %arg2: i32) -> (i32, i32, i32, i32) {
    %c1_i32 = arith.constant 1 : i32
    %0 = arith.addi %arg1, %c1_i32 : i32
    %c0_i32 = arith.constant 0 : i32
    %c0_i32_0 = arith.constant 0 : i32
    return %arg0, %0, %c0_i32, %arg2 : i32, i32, i32, i32
  }
  func.func @transform_2(%arg0: i32, %arg1: i32, %arg2: i32) -> (i32, i32, i32, i32) {
    %c0_i32 = arith.constant 0 : i32
    %c0_i32_0 = arith.constant 0 : i32
    %c0_i32_1 = arith.constant 0 : i32
    return %arg0, %arg1, %c0_i32, %c0_i32_0 : i32, i32, i32, i32
  }
  func.func @transform_3(%arg0: i32, %arg1: i32, %arg2: i32) -> (i32, i32, i32, i32) {
    %c0_i32 = arith.constant 0 : i32
    %c0_i32_0 = arith.constant 0 : i32
    %c0_i32_1 = arith.constant 0 : i32
    return %arg0, %arg1, %c0_i32, %c0_i32_0 : i32, i32, i32, i32
  }
}

</mosaic_0001>

<bundles_post_ra>
// kernel: tpu_custom_call.1
= control target key start
LH: loop header
LB: loop body
LE: loop exit
PB: predicated region body
PF: predicated region fallthrough
CT: control target
= control target key end

     0   :  { %9 = vsyncpa [#allocation3], 0  ;;  %s904_s0 = inlined_call_operand.hbm [shape: f32[2,6,8,32], index: 0, kind: input, shape index: {}]   ;;  %s905_s1 = inlined_call_operand.hbm [shape: f32[2,6,8,32], index: 1, kind: input, shape index: {}]   ;;  %s906_s2 = inlined_call_operand.vmem [shape: f32[2,5,8,1], index: 2, kind: output, shape index: {0}]   ;;  %s907_s3 = inlined_call_operand.vmem [shape: f32[2,5,8,1], index: 3, kind: output, shape index: {1}]  }
   0x1   :  { %11 = vsyncpa [#allocation3 + $0x1], 0 }
   0x2   :  { %12 = vsyncpa [#allocation5], 0 }
   0x3   :  { %14 = vsyncpa [#allocation5 + $0x1], 0  ;;  %s743_s12 = smov 0   ;;  %s745_s13 = smov 0  }
   0x4   :  { %s747_s14 = smov 0   ;;  %s749_s15 = smov 0  }
   0x5   :  { %s751_s16 = smov 0   ;;  %s753_s17 = smov 0  }
   0x6   :  { %s755_s18 = smov 0   ;;  %s757_s19 = smov 0  }
   0x7 LB: > { %s495_s20 = sadd.s32 4294967295, %s718_s19   ;;  %s35_s21 = sadd.s32 1, %s710_s17  ;;  %s718_s19 = sphi %s757_s19, %s20_s19   ;;  %s714_s18 = sphi %s755_s18, %s918_s18   ;;  %s710_s17 = sphi %s753_s17, %s917_s17   ;;  %s706_s16 = sphi %s751_s16, %s916_s16   ;;  %s702_s15 = sphi %s749_s15, %s915_s15   ;;  %s698_s14 = sphi %s747_s14, %s914_s14   ;;  %s694_s13 = sphi %s745_s13, %s913_s13   ;;  %s690_s12 = sphi %s743_s12, %s912_s12  }
   0x8   : > { %p37_p0 = scmp.ge.s32.totalorder %s35_s21, 5  ;;  %s39_s22 = sadd.s32 1, %s714_s18 }
   0x9   : > { %s52_s23 = sadd.s32 1, %s698_s14  ;;  %p59_p1 = scmp.ne.s32.totalorder %s698_s14, %s694_s13 }
   0xa   : > { %s787_s24 = scalar_select %p37_p0, 0, %s35_s21  }
   0xb   : > { %s920_s22 = smov (!%p37_p0, %s39_s22), %s714_s18  ;;  %p60_p2 = scmp.eq.s32.totalorder %s718_s19, 0 }
   0xc   : > { %s44_s25 = sadd.s32 1, %s787_s24  ;;  %p41_p3 = scmp.ge.s32.totalorder %s920_s22, 2 }
   0xd   : > { %s46_s26 = ssub.s32 %s35_s21, %s44_s25  ;;  %p792_p4 = por %p60_p2, %p59_p1 }
   0xe   : > { %p65_p5 = scmp.ne.s32.totalorder %s694_s13, %s690_s12  ;;  %s922_s22 = smov (%p41_p3, %s920_s22), 0 }
   0xf   : > { %p66_p6 = scmp.eq.s32.totalorder %s495_s20, 0  ;;  %s45_s28 = ssub.s32 %s714_s18, %s922_s22 }
  0x10   : > { %p522_p7 = scmp.lt.s32.totalorder %s718_s19, 10  ;;  %s47_s29 = sor.u32 %s46_s26, %s45_s28 }
  0x11   : > { %p802_p8 = por %p66_p6, %p65_p5  ;;  %p50_p9 = scmp.eq.s32.totalorder %s47_s29, 0 }
  0x12   : > { %s807_s4 = sand.u32 1, %s698_s14   ;;  %s381_s7 = smul.u32 6, %s714_s18 }
  0x13   : > { %s499_s5 = sshll.u32 %s807_s4, 3  ;;  %p818_p10 = pnand %p522_p7, %p792_p4 }
  0x14   : > { %s811_s6 = scalar_select %p50_p9, %s698_s14, %s52_s23  }
  0x15   : > { %s181_s8 = scalar_lea.vmem [#allocation2], %s499_s5  ;;  %s382_s11 = sadd.s32 %s710_s17, %s381_s7 }
  0x16   : > { %s192_s9 = sshll.u32 %s181_s8, 4  ;;  %s500_s12 = sshll.u32 %s382_s11, 7  ;;  %s193_s9 = int_to_ptr.vmem [resolvable:$true] %s192_s9 }
  0x17   : > { %s384_s25 = scalar_lea.hbm %s904_s0, %s500_s12  ;;  %p503_p11 = scmp.ge.s32.totalorder %s718_s19, 1 }
  0x18   : > { %s385_s23 = scalar_lea.hbm %s384_s25, 128  ;;  %p219_p12 = scmp.lt.s32.totalorder %s718_s19, 11 }
  0x19   : > { %s178_s26 = scalar_lea.sflag [#allocation3], %s807_s4  ;;  %p592_p13 = pneg %p818_p10 }
  0x1a   : > { %s603_s27 = scalar_lea.vmem %s193_s9, 128  ;;  %s720_s28 = smov [#allocation2]  }
  0x1b   : > { %p604_p0 = scmp.ne.s32.totalorder %s193_s9, %s603_s27  ;;  %s608_s29 = sshll.u32 %s720_s28, 4  ;;  %s609_s29 = int_to_ptr.vmem [resolvable:$false] %s608_s29 }
  0x1c   : > { %s610_s7 = scalar_lea.vmem %s609_s29, 256  ;;  %p611_p3 = scmp.lt.s32.totalorder %s193_s9, %s609_s29 }
  0x1d   : > { %p606_p1 = pnand %p604_p0, %p592_p13  ;;  %p612_p4 = scmp.lt.s32.totalorder %s610_s7, %s603_s27 }
  0x1f   : > { %p607_p2 = pneg %p606_p1  ;;  %p613_p5 = por %p612_p4, %p611_p3 }
  0x21   : > { %p614_p6 = pnand %p613_p5, %p607_p2 }
  0x23   : > { %617 = shalt.err (!%p614_p6)
}
  0x24   : > { %518 = dma.hbm_to_vmem [thread:$0]  (!%p818_p10), %s385_s23, 128, %s193_s9, %s178_s26  }
  0x25   : > { %p840_p7 = pnand %p503_p11, %p219_p12  ;;  %s393_s21 = scalar_lea.hbm %s905_s1, %s500_s12 }
  0x26   : > { %s394_s25 = scalar_lea.hbm %s393_s21, 128  ;;  %s203_s27 = scalar_lea.vmem [#allocation4], %s499_s5 }
  0x27   : > { %s214_s28 = sshll.u32 %s203_s27, 4  ;;  %s200_s29 = scalar_lea.sflag [#allocation5], %s807_s4  ;;  %s215_s28 = int_to_ptr.vmem [resolvable:$true] %s214_s28 }
  0x28   : > { %s632_s7 = scalar_lea.vmem %s215_s28, 128  ;;  %s721_s9 = smov [#allocation4]  }
  0x29   : > { %p633_p9 = scmp.ne.s32.totalorder %s215_s28, %s632_s7  ;;  %s637_s23 = sshll.u32 %s721_s9, 4  ;;  %s638_s23 = int_to_ptr.vmem [resolvable:$false] %s637_s23 }
  0x2a   : > { %s639_s26 = scalar_lea.vmem %s638_s23, 256  ;;  %p640_p11 = scmp.lt.s32.totalorder %s215_s28, %s638_s23 }
  0x2b   : > { %p635_p0 = pnand %p633_p9, %p592_p13  ;;  %p641_p12 = scmp.lt.s32.totalorder %s639_s26, %s632_s7 }
  0x2d   : > { %p636_p1 = pneg %p635_p0  ;;  %p642_p2 = por %p641_p12, %p640_p11 }
  0x2f   : > { %p643_p3 = pnand %p642_p2, %p636_p1 }
  0x31   : > { %646 = shalt.err (!%p643_p3)
}
  0x32   : > { %521 = dma.hbm_to_vmem [thread:$0]  (!%p818_p10), %s394_s25, 128, %s215_s28, %s200_s29  }
  0x33   : > { %223 = sbr.rel (%p840_p7) target bundleno = 224 (0xe0), region = 28  ;;  %s225_s4 = sand.u32 (!%p840_p7), 1, %s694_s13  }
  0x34   : > { %s504_s5 = sshll.u32 (!%p840_p7), %s225_s4, 3  ;;  %s226_s12 = scalar_lea.sflag (!%p840_p7), [#allocation3], %s225_s4 }
  0x35   : > { %s229_s11 = scalar_lea.vmem (!%p840_p7), [#allocation2], %s504_s5 }
  0x38   : > { %681 = dma.done.wait (%p802_p8), %s226_s12, 128  }
  0x39   : > { %683 = vsyncadd (%p802_p8), %s226_s12, 4294967168  ;;  %s235_s20 = scalar_lea.sflag [#allocation5], %s225_s4  ;;  %s238_s21 = scalar_lea.vmem [#allocation4], %s504_s5 }
  0x3a   : > { %685 = dma.done.wait (%p802_p8), %s235_s20, 128  }
  0x3b   : > { %687 = vsyncadd (%p802_p8), %s235_s20, 4294967168  ;;  %p279_p10 = scmp.lt.s32.totalorder %s706_s16, 1  ;;  %p281_p13 = scmp.lt.s32.totalorder %s702_s15, 4  ;;  %vm299_vm0 = vcmask 7168   ;;  %v302_v0 = vld [vmem:[%s229_s11] sm:$0xff]  ;;  %v722_v2 = vmov 0.0  }
  0x3c   : > { %v304_v1 = vmul.f32 1.442695, %v302_v0  ;;  %v303_v3 = vld [vmem:[%s238_s21] sm:$0xff]  ;;  %vm308_vm1 = vcmask 261120  }
  0x3d   : > { %s924_s16 = smov (!%p279_p10, %s706_s16), 1  ;;  %s926_s15 = smov (!%p281_p13, %s702_s15), 4 }
  0x3e   : > { %s510_s10 = smul.u32 5, %s924_s16  ;;  %588 = vpow2.f32 %v304_v1 }
  0x40   : > { %s284_s8 = sadd.s32 %s510_s10, %s926_s15 }
  0x41   : > { %s506_s25 = sshll.u32 %s284_s8, 3 }
  0x42   : > { %s286_s29 = scalar_lea.vmem %s906_s2, %s506_s25  ;;  %s294_s30 = scalar_lea.vmem %s907_s3, %s506_s25 }
  0x43   : > { %300 = vst.msk [vmem:[%s286_s29] sm:$0xff] %vm299_vm0, %v722_v2  ;;  %301 = vst.msk [vmem:[%s294_s30] sm:$0xff] %vm299_vm0, %v722_v2 }
  0x4a   : > { %v306_v9 = vld [vmem:[%s286_s29] sm:$0xff] }
  0x4b   : > { %v589_v4 = vpop.eup %588  ;;  %v315_v12 = vld [vmem:[%s294_s30] sm:$0xff] }
  0x4c   : > { %v307_v5 = vmul.f32 %v589_v4, %v303_v3  ;;  %v316_v6 = vadd.f32 %v589_v4, %v303_v3 }
  0x4e   : > { %v309_v7 = vsel %vm308_vm1, %v307_v5, 0.0  ;;  %v317_v8 = vsel %vm308_vm1, %v316_v6, 0.0 }
  0x4f   : > { %310 = vadd.xlane.f32.xlu0 %v309_v7 }
  0x53   : > { %318 = vadd.xlane.f32.xlu0 %v317_v8 }
  0xd8   : > { %v311_v10 = vpop.xlane.xlu0 %310 }
  0xd9   : > { %v312_v11 = vadd.f32 %v311_v10, %v306_v9 }
  0xdb   : > { %314 = vst.msk [vmem:[%s286_s29] sm:$0xff] %vm299_vm0, %v312_v11 }
  0xdc   : > { %v319_v13 = vpop.xlane.xlu0 %318 }
  0xdd   : > { %v320_v14 = vadd.f32 %v319_v13, %v315_v12 }
  0xdf   : > { %321 = vst.msk [vmem:[%s294_s30] sm:$0xff] %vm299_vm0, %v320_v14 }
  0xe0 PF: > { %s20_s19 = sadd.s32 1, %s718_s19   ;;  %s912_s12 = smov %s694_s13 }
  0xe1   : > { %p17_p8 = scmp.ge.s32.totalorder %s20_s19, 12   ;;  %s913_s13 = smov %s698_s14 }
  0xe2   : > { %s914_s14 = smov %s811_s6  ;;  %s915_s15 = smov %s710_s17 }
  0xe3   : > { %s916_s16 = smov %s714_s18  ;;  %s917_s17 = smov %s787_s24 }
  0xe4   : > { %s918_s18 = smov %s922_s22  ;;  %19 = sbr.rel (!%p17_p8) target bundleno = 7 (0x7), region = 97 }
  0xe9   :  { %371 = vsyncpa [#allocation3], 1 }
  0xea   :  { %373 = vsyncpa [#allocation3 + $0x1], 1 }
  0xeb   :  { %374 = vsyncpa [#allocation5], 1 }
  0xec   :  { %376 = vsyncpa [#allocation5 + $0x1], 1 }

</bundles_post_ra>
